<compile_context>
chip_gen: v5e
topology: v5e:2x2
jax: 0.10.0
libtpu: 0.0.40
codegen_flags: <defaults>
</compile_context>

<pallas_src>
import jax
import jax.numpy as jnp
from jax.experimental import pallas as pl
from jax.experimental.pallas import tpu as pltpu


def _conv3x3_row_weights(w_oihw, W):
    """OIHW 3x3 conv weight -> (3, W*Cin, W*Cout) row-Toeplitz matrices (pad=1).

    mat[kh, w_in*Cin + ci, w_out*Cout + co] = w_oihw[co, ci, kh, kw]
      whenever w_in == w_out + kw - 1 (horizontal pad handled by the band edge),
    so that   out_row(h_out) = sum_kh  x_row(h_out + kh) @ mat[kh]
    reproduces a stride-1, pad-1 3x3 convolution with the kw taps folded into a
    block-banded weight matrix.  No (W+2) lane padding: K is exactly W*Cin.
    """
    wk = jnp.transpose(w_oihw, (2, 3, 1, 0)).astype(jnp.float32)  # (3,3,Cin,Cout)
    mats = []
    for kh in range(3):
        m = None
        for kw in range(3):
            sel = jnp.eye(W, W, k=1 - kw, dtype=jnp.float32)  # sel[w_in, w_out]
            blk = jnp.kron(sel, wk[kh, kw])
            m = blk if m is None else m + blk
        mats.append(m)
    return jnp.stack(mats, axis=0)


def _make_kernel(H, W, chid, learned_shortcut, is_bias):
    """Build the per-batch-element kernel body (static config baked in)."""

    def kernel(*refs):
        refs = list(refs)
        x_ref = refs.pop(0)                            # (1, H+2, W*Cin)
        w0_ref = refs.pop(0)                           # (3, W*Cin, W*Chid)
        b0_ref = refs.pop(0)                           # (1, W*Chid)
        w1_ref = refs.pop(0)                           # (3, W*Chid, W*Cout), alpha folded
        b1_ref = refs.pop(0) if is_bias else None      # (1, W*Cout), alpha folded
        ws_ref = refs.pop(0) if learned_shortcut else None  # (W*Cin, W*Cout)
        o_ref = refs.pop(0)                            # (1, H, W*Cout)
        hp_ref = refs.pop(0)                           # VMEM (H+2, W*Chid)

        x = x_ref[0].astype(jnp.float32)               # (H+2, W*Cin), lane-dense
        # leaky_relu(., 0.2) as 2 VALU ops; lrelu(0)=0 so padded rows stay zero.
        xa = jnp.maximum(x, 0.2 * x)

        # ---- conv_0: 3 MXU matmuls (one per kh tap); kw taps live in the weight.
        h = jnp.dot(xa[0:H, :], w0_ref[0], preferred_element_type=jnp.float32)
        h = h + jnp.dot(xa[1:1 + H, :], w0_ref[1],
                        preferred_element_type=jnp.float32)
        h = h + jnp.dot(xa[2:2 + H, :], w0_ref[2],
                        preferred_element_type=jnp.float32)
        h = h + b0_ref[...]                            # (H, W*Chid) + (1, W*Chid)
        h = jnp.maximum(h, 0.2 * h)

        # ---- vertically padded hidden activation: zero ONLY the boundary rows,
        # store the interior once (no full-buffer zero-init pass).
        zrow = jnp.zeros((1, W * chid), jnp.float32)
        hp_ref[0:1, :] = zrow
        hp_ref[H + 1:H + 2, :] = zrow
        hp_ref[1:1 + H, :] = h
        # TODO(synk): the store+3-reload round-trip could be removed entirely by
        # feeding sublane-shifted views of `h` into the kh=0/2 taps.

        # ---- conv_1 (alpha pre-folded into w1/b1): same 3-matmul structure.
        dx = jnp.dot(hp_ref[0:H, :], w1_ref[0], preferred_element_type=jnp.float32)
        dx = dx + jnp.dot(hp_ref[1:1 + H, :], w1_ref[1],
                          preferred_element_type=jnp.float32)
        dx = dx + jnp.dot(hp_ref[2:2 + H, :], w1_ref[2],
                          preferred_element_type=jnp.float32)
        if b1_ref is not None:
            dx = dx + b1_ref[...]

        # ---- shortcut (uses the raw, un-activated input rows).
        x_int = x[1:1 + H, :]                          # (H, W*Cin), no lane offset
        if ws_ref is not None:
            x_s = jnp.dot(x_int, ws_ref[...], preferred_element_type=jnp.float32)
        else:
            x_s = x_int                                # Cin == Cout, identity path

        o_ref[0] = (x_s + dx).astype(o_ref.dtype)      # full-lane (H, W*Cout) store

    return kernel


def resnet_block_pallas(x_nchw, w0, b0, w1, b1, ws=None, *, alpha=0.1,
                        is_bias=True):
    """x_nchw: (B, Cin, H, W) float32.  Conv weights in PyTorch OIHW layout."""
    B, Cin, H, W = x_nchw.shape
    Chid = w0.shape[0]
    Cout = w1.shape[0]
    learned_shortcut = Cin != Cout
    if learned_shortcut and ws is None:
        raise ValueError("learned shortcut requires ws (1x1 conv weight)")

    # NCHW -> NHWC, zero-pad vertically by 1 row only (horizontal pad lives in
    # the Toeplitz band edges), fold W onto the 128-lane axis (lane-dense W*C).
    x_nhwc = jnp.transpose(x_nchw, (0, 2, 3, 1)).astype(jnp.float32)
    x_pad = jnp.pad(x_nhwc, ((0, 0), (1, 1), (0, 0), (0, 0)))
    x_rows = x_pad.reshape(B, H + 2, W * Cin)

    # Row-Toeplitz conv weights, tiled biases.  alpha is folded into conv_1 so
    # the kernel computes x_s + dx directly.
    w0_rows = _conv3x3_row_weights(w0, W)                       # (3, W*Cin, W*Chid)
    b0_row = jnp.tile(b0.astype(jnp.float32), W).reshape(1, W * Chid)
    w1_rows = alpha * _conv3x3_row_weights(w1, W)               # (3, W*Chid, W*Cout)

    inputs = [x_rows, w0_rows, b0_row, w1_rows]
    in_specs = [
        pl.BlockSpec((1, H + 2, W * Cin), lambda b: (b, 0, 0)),
        # Constant index_maps: weights/biases stay VMEM-resident across steps.
        pl.BlockSpec((3, W * Cin, W * Chid), lambda b: (0, 0, 0)),
        pl.BlockSpec((1, W * Chid), lambda b: (0, 0)),
        pl.BlockSpec((3, W * Chid, W * Cout), lambda b: (0, 0, 0)),
    ]
    if is_bias:
        b1_row = alpha * jnp.tile(b1.astype(jnp.float32), W).reshape(1, W * Cout)
        inputs.append(b1_row)
        in_specs.append(pl.BlockSpec((1, W * Cout), lambda b: (0, 0)))
    if learned_shortcut:
        ws2 = jnp.transpose(ws[:, :, 0, 0], (1, 0)).astype(jnp.float32)  # (Cin,Cout)
        ws_rows = jnp.kron(jnp.eye(W, dtype=jnp.float32), ws2)  # (W*Cin, W*Cout)
        inputs.append(ws_rows)
        in_specs.append(pl.BlockSpec((W * Cin, W * Cout), lambda b: (0, 0)))
    # (No dead inputs are DMA'd: b1/ws are only passed when actually used.)

    kernel = _make_kernel(H, W, Chid, learned_shortcut, is_bias)

    # Useful conv FLOPs (not the inflated dense-Toeplitz FLOPs).
    flops = 2 * B * H * W * (9 * Cin * Chid + 9 * Chid * Cout
                             + Cin * Cout * int(learned_shortcut))
    bytes_accessed = 4 * (sum(int(a.size) for a in inputs) + B * H * W * Cout)

    out_slab = pl.pallas_call(
        kernel,
        out_shape=jax.ShapeDtypeStruct((B, H, W * Cout), x_nchw.dtype),
        grid_spec=pltpu.PrefetchScalarGridSpec(
            num_scalar_prefetch=0,
            grid=(B,),
            in_specs=in_specs,
            out_specs=pl.BlockSpec((1, H, W * Cout), lambda b: (b, 0, 0)),
            scratch_shapes=[pltpu.VMEM((H + 2, W * Chid), jnp.float32)],
        ),
        compiler_params=pltpu.CompilerParams(
            dimension_semantics=("parallel",)),   # shards batch across TCs on v7x
        cost_estimate=pl.CostEstimate(flops=flops, transcendentals=0,
                                      bytes_accessed=bytes_accessed),
    )(*inputs)

    # Lane-dense slab -> NCHW (cheap XLA layout work outside the kernel).
    out_nhwc = out_slab.reshape(B, H, W, Cout)
    return jnp.transpose(out_nhwc, (0, 3, 1, 2))


def _reference(x_nchw, w0, b0, w1, b1, ws, *, alpha=0.1, is_bias=True):
    """Pure-JAX reference (lax.conv) for correctness check."""
    Cout = w1.shape[0]
    learned = x_nchw.shape[1] != Cout

    def conv(x, w, b, pad):
        y = jax.lax.conv_general_dilated(
            x, w, window_strides=(1, 1),
            padding=[(pad, pad), (pad, pad)],
            dimension_numbers=('NCHW', 'OIHW', 'NCHW'),
            precision=jax.lax.Precision.HIGHEST)
        if b is not None:
            y = y + b[None, :, None, None]
        return y

    lr = lambda t: jnp.where(t >= 0, t, 0.2 * t)
    x_s = conv(x_nchw, ws, None, 0) if learned else x_nchw
    dx = conv(lr(x_nchw), w0, b0, 1)
    dx = conv(lr(dx), w1, b1 if is_bias else None, 1)
    return x_s + alpha * dx


if __name__ == "__main__":
    # ResnetBlock(fin=4, fout=8) -> fhidden = min(4, 8) = 4, learned shortcut.
    B, fin, H, W = 2, 4, 16, 16
    fout = 8
    fhidden = min(fin, fout)
    is_bias = True
    alpha = 0.1

    key = jax.random.PRNGKey(0)
    kx, k0, kb0, k1, kb1, ks = jax.random.split(key, 6)

    x = jax.random.normal(kx, (B, fin, H, W), dtype=jnp.float32)
    # Deterministic synthetic parameters (PyTorch OIHW conv weight layout).
    w0 = 0.1 * jax.random.normal(k0, (fhidden, fin, 3, 3), dtype=jnp.float32)
    b0 = 0.1 * jax.random.normal(kb0, (fhidden,), dtype=jnp.float32)
    w1 = 0.1 * jax.random.normal(k1, (fout, fhidden, 3, 3), dtype=jnp.float32)
    b1 = 0.1 * jax.random.normal(kb1, (fout,), dtype=jnp.float32)
    ws = 0.1 * jax.random.normal(ks, (fout, fin, 1, 1), dtype=jnp.float32)

    out = resnet_block_pallas(x, w0, b0, w1, b1, ws, alpha=alpha, is_bias=is_bias)
    out = jax.block_until_ready(out)

    ref = _reference(x, w0, b0, w1, b1, ws, alpha=alpha, is_bias=is_bias)
    assert out.shape == (B, fout, H, W), out.shape
    max_err = float(jnp.max(jnp.abs(out - ref)))
    assert jnp.allclose(out, ref, rtol=1e-4, atol=1e-4), max_err

    print("KERNEL_OK")
</pallas_src>

<mosaic_0001>
module attributes {stable_mosaic.version = 11 : i64} {
  func.func @kernel(%arg0: i32, %arg1: memref<1x18x64xf32, #tpu.memory_space<vmem>>, %arg2: memref<3x64x64xf32, #tpu.memory_space<vmem>>, %arg3: memref<1x64xf32, #tpu.memory_space<vmem>>, %arg4: memref<3x64x128xf32, #tpu.memory_space<vmem>>, %arg5: memref<1x128xf32, #tpu.memory_space<vmem>>, %arg6: memref<64x128xf32, #tpu.memory_space<vmem>>, %arg7: memref<1x16x128xf32, #tpu.memory_space<vmem>>, %arg8: memref<18x64xf32, #tpu.memory_space<vmem>>) attributes {dimension_semantics = [#tpu.dimension_semantics<parallel>], iteration_bounds = array<i64: 2>, scalar_prefetch = 0 : i64, scratch_operands = 1 : i64, tpu.core_type = #tpu.core_type<tc>, window_params = [{transform_indices = @transform_0, window_bounds = array<i64: 1, 18, 64>}, {pipeline_mode = #tpu.pipeline_mode<synchronous>, transform_indices = @transform_1, window_bounds = array<i64: 3, 64, 64>}, {pipeline_mode = #tpu.pipeline_mode<synchronous>, transform_indices = @transform_2, window_bounds = array<i64: 1, 64>}, {pipeline_mode = #tpu.pipeline_mode<synchronous>, transform_indices = @transform_3, window_bounds = array<i64: 3, 64, 128>}, {pipeline_mode = #tpu.pipeline_mode<synchronous>, transform_indices = @transform_4, window_bounds = array<i64: 1, 128>}, {pipeline_mode = #tpu.pipeline_mode<synchronous>, transform_indices = @transform_5, window_bounds = array<i64: 64, 128>}, {transform_indices = @transform_6, window_bounds = array<i64: 1, 16, 128>}]} {
    %c0 = arith.constant 0 : index
    %c0_0 = arith.constant 0 : index
    %c0_1 = arith.constant 0 : index
    %0 = vector.load %arg1[%c0, %c0_0, %c0_1] : memref<1x18x64xf32, #tpu.memory_space<vmem>>, vector<1x18x64xf32>
    %1 = vector.shape_cast %0 : vector<1x18x64xf32> to vector<18x64xf32>
    %cst = arith.constant 2.000000e-01 : f32
    %2 = vector.broadcast %cst : f32 to vector<18x64xf32>
    %3 = arith.mulf %2, %1 : vector<18x64xf32>
    %4 = arith.maximumf %1, %3 : vector<18x64xf32>
    %5 = vector.extract_strided_slice %4 {offsets = [0, 0], sizes = [16, 64], strides = [1, 1]} : vector<18x64xf32> to vector<16x64xf32>
    %c0_2 = arith.constant 0 : index
    %c0_3 = arith.constant 0 : index
    %c0_4 = arith.constant 0 : index
    %6 = vector.load %arg2[%c0_2, %c0_3, %c0_4] : memref<3x64x64xf32, #tpu.memory_space<vmem>>, vector<1x64x64xf32>
    %7 = vector.shape_cast %6 : vector<1x64x64xf32> to vector<64x64xf32>
    %cst_5 = arith.constant dense<0.000000e+00> : vector<16x64xf32>
    %8 = tpu.matmul %5, %7, %cst_5 {dimension_numbers = #tpu.dot_dimension_numbers<[1], [0], [0], [1], [0, 0, 1, 1], [], []>} : vector<16x64xf32>, vector<64x64xf32>, vector<16x64xf32> -> vector<16x64xf32>
    %9 = vector.extract_strided_slice %4 {offsets = [1, 0], sizes = [16, 64], strides = [1, 1]} : vector<18x64xf32> to vector<16x64xf32>
    %c1 = arith.constant 1 : index
    %c0_6 = arith.constant 0 : index
    %c0_7 = arith.constant 0 : index
    %10 = vector.load %arg2[%c1, %c0_6, %c0_7] : memref<3x64x64xf32, #tpu.memory_space<vmem>>, vector<1x64x64xf32>
    %11 = vector.shape_cast %10 : vector<1x64x64xf32> to vector<64x64xf32>
    %cst_8 = arith.constant dense<0.000000e+00> : vector<16x64xf32>
    %12 = tpu.matmul %9, %11, %cst_8 {dimension_numbers = #tpu.dot_dimension_numbers<[1], [0], [0], [1], [0, 0, 1, 1], [], []>} : vector<16x64xf32>, vector<64x64xf32>, vector<16x64xf32> -> vector<16x64xf32>
    %13 = arith.addf %8, %12 : vector<16x64xf32>
    %14 = vector.extract_strided_slice %4 {offsets = [2, 0], sizes = [16, 64], strides = [1, 1]} : vector<18x64xf32> to vector<16x64xf32>
    %c2 = arith.constant 2 : index
    %c0_9 = arith.constant 0 : index
    %c0_10 = arith.constant 0 : index
    %15 = vector.load %arg2[%c2, %c0_9, %c0_10] : memref<3x64x64xf32, #tpu.memory_space<vmem>>, vector<1x64x64xf32>
    %16 = vector.shape_cast %15 : vector<1x64x64xf32> to vector<64x64xf32>
    %cst_11 = arith.constant dense<0.000000e+00> : vector<16x64xf32>
    %17 = tpu.matmul %14, %16, %cst_11 {dimension_numbers = #tpu.dot_dimension_numbers<[1], [0], [0], [1], [0, 0, 1, 1], [], []>} : vector<16x64xf32>, vector<64x64xf32>, vector<16x64xf32> -> vector<16x64xf32>
    %18 = arith.addf %13, %17 : vector<16x64xf32>
    %c0_12 = arith.constant 0 : index
    %c0_13 = arith.constant 0 : index
    %19 = vector.load %arg3[%c0_12, %c0_13] : memref<1x64xf32, #tpu.memory_space<vmem>>, vector<1x64xf32>
    %20 = vector.broadcast %19 : vector<1x64xf32> to vector<16x64xf32>
    %21 = arith.addf %18, %20 : vector<16x64xf32>
    %cst_14 = arith.constant 2.000000e-01 : f32
    %22 = vector.broadcast %cst_14 : f32 to vector<16x64xf32>
    %23 = arith.mulf %22, %21 : vector<16x64xf32>
    %24 = arith.maximumf %21, %23 : vector<16x64xf32>
    %cst_15 = arith.constant 0.000000e+00 : f32
    %25 = vector.broadcast %cst_15 : f32 to vector<1x64xf32>
    %c0_16 = arith.constant 0 : index
    %c0_17 = arith.constant 0 : index
    %26 = vector.load %arg8[%c0_16, %c0_17] : memref<18x64xf32, #tpu.memory_space<vmem>>, vector<1x64xf32>
    tpu.vector_store %arg8[%c0_16, %c0_17], %25 {strides = array<i32>} : memref<18x64xf32, #tpu.memory_space<vmem>>, vector<1x64xf32>,
    %c17 = arith.constant 17 : index
    %c0_18 = arith.constant 0 : index
    %27 = vector.load %arg8[%c17, %c0_18] : memref<18x64xf32, #tpu.memory_space<vmem>>, vector<1x64xf32>
    tpu.vector_store %arg8[%c17, %c0_18], %25 {strides = array<i32>} : memref<18x64xf32, #tpu.memory_space<vmem>>, vector<1x64xf32>,
    %c1_19 = arith.constant 1 : index
    %c0_20 = arith.constant 0 : index
    %28 = vector.load %arg8[%c1_19, %c0_20] : memref<18x64xf32, #tpu.memory_space<vmem>>, vector<16x64xf32>
    tpu.vector_store %arg8[%c1_19, %c0_20], %24 {strides = array<i32>} : memref<18x64xf32, #tpu.memory_space<vmem>>, vector<16x64xf32>,
    %c0_21 = arith.constant 0 : index
    %c0_22 = arith.constant 0 : index
    %29 = vector.load %arg8[%c0_21, %c0_22] : memref<18x64xf32, #tpu.memory_space<vmem>>, vector<16x64xf32>
    %c0_23 = arith.constant 0 : index
    %c0_24 = arith.constant 0 : index
    %c0_25 = arith.constant 0 : index
    %30 = vector.load %arg4[%c0_23, %c0_24, %c0_25] : memref<3x64x128xf32, #tpu.memory_space<vmem>>, vector<1x64x128xf32>
    %31 = vector.shape_cast %30 : vector<1x64x128xf32> to vector<64x128xf32>
    %cst_26 = arith.constant dense<0.000000e+00> : vector<16x128xf32>
    %32 = tpu.matmul %29, %31, %cst_26 {dimension_numbers = #tpu.dot_dimension_numbers<[1], [0], [0], [1], [0, 0, 1, 1], [], []>} : vector<16x64xf32>, vector<64x128xf32>, vector<16x128xf32> -> vector<16x128xf32>
    %c1_27 = arith.constant 1 : index
    %c0_28 = arith.constant 0 : index
    %33 = vector.load %arg8[%c1_27, %c0_28] : memref<18x64xf32, #tpu.memory_space<vmem>>, vector<16x64xf32>
    %c1_29 = arith.constant 1 : index
    %c0_30 = arith.constant 0 : index
    %c0_31 = arith.constant 0 : index
    %34 = vector.load %arg4[%c1_29, %c0_30, %c0_31] : memref<3x64x128xf32, #tpu.memory_space<vmem>>, vector<1x64x128xf32>
    %35 = vector.shape_cast %34 : vector<1x64x128xf32> to vector<64x128xf32>
    %cst_32 = arith.constant dense<0.000000e+00> : vector<16x128xf32>
    %36 = tpu.matmul %33, %35, %cst_32 {dimension_numbers = #tpu.dot_dimension_numbers<[1], [0], [0], [1], [0, 0, 1, 1], [], []>} : vector<16x64xf32>, vector<64x128xf32>, vector<16x128xf32> -> vector<16x128xf32>
    %37 = arith.addf %32, %36 : vector<16x128xf32>
    %c2_33 = arith.constant 2 : index
    %c0_34 = arith.constant 0 : index
    %38 = vector.load %arg8[%c2_33, %c0_34] : memref<18x64xf32, #tpu.memory_space<vmem>>, vector<16x64xf32>
    %c2_35 = arith.constant 2 : index
    %c0_36 = arith.constant 0 : index
    %c0_37 = arith.constant 0 : index
    %39 = vector.load %arg4[%c2_35, %c0_36, %c0_37] : memref<3x64x128xf32, #tpu.memory_space<vmem>>, vector<1x64x128xf32>
    %40 = vector.shape_cast %39 : vector<1x64x128xf32> to vector<64x128xf32>
    %cst_38 = arith.constant dense<0.000000e+00> : vector<16x128xf32>
    %41 = tpu.matmul %38, %40, %cst_38 {dimension_numbers = #tpu.dot_dimension_numbers<[1], [0], [0], [1], [0, 0, 1, 1], [], []>} : vector<16x64xf32>, vector<64x128xf32>, vector<16x128xf32> -> vector<16x128xf32>
    %42 = arith.addf %37, %41 : vector<16x128xf32>
    %c0_39 = arith.constant 0 : index
    %c0_40 = arith.constant 0 : index
    %43 = vector.load %arg5[%c0_39, %c0_40] : memref<1x128xf32, #tpu.memory_space<vmem>>, vector<1x128xf32>
    %44 = vector.broadcast %43 : vector<1x128xf32> to vector<16x128xf32>
    %45 = arith.addf %42, %44 : vector<16x128xf32>
    %46 = vector.extract_strided_slice %1 {offsets = [1, 0], sizes = [16, 64], strides = [1, 1]} : vector<18x64xf32> to vector<16x64xf32>
    %c0_41 = arith.constant 0 : index
    %c0_42 = arith.constant 0 : index
    %47 = vector.load %arg6[%c0_41, %c0_42] : memref<64x128xf32, #tpu.memory_space<vmem>>, vector<64x128xf32>
    %cst_43 = arith.constant dense<0.000000e+00> : vector<16x128xf32>
    %48 = tpu.matmul %46, %47, %cst_43 {dimension_numbers = #tpu.dot_dimension_numbers<[1], [0], [0], [1], [0, 0, 1, 1], [], []>} : vector<16x64xf32>, vector<64x128xf32>, vector<16x128xf32> -> vector<16x128xf32>
    %49 = arith.addf %48, %45 : vector<16x128xf32>
    %c0_44 = arith.constant 0 : index
    %c0_45 = arith.constant 0 : index
    %c0_46 = arith.constant 0 : index
    %50 = vector.load %arg7[%c0_44, %c0_45, %c0_46] : memref<1x16x128xf32, #tpu.memory_space<vmem>>, vector<1x16x128xf32>
    %51 = vector.shape_cast %50 : vector<1x16x128xf32> to vector<16x128xf32>
    %52 = vector.shape_cast %49 : vector<16x128xf32> to vector<1x16x128xf32>
    tpu.vector_store %arg7[%c0_44, %c0_45, %c0_46], %52 {strides = array<i32>} : memref<1x16x128xf32, #tpu.memory_space<vmem>>, vector<1x16x128xf32>,
    return
  }
  func.func @transform_0(%arg0: i32) -> (i32, i32, i32) {
    %c0_i32 = arith.constant 0 : i32
    %c0_i32_0 = arith.constant 0 : i32
    %c0_i32_1 = arith.constant 0 : i32
    return %arg0, %c0_i32, %c0_i32_0 : i32, i32, i32
  }
  func.func @transform_1(%arg0: i32) -> (i32, i32, i32) {
    %c0_i32 = arith.constant 0 : i32
    %c0_i32_0 = arith.constant 0 : i32
    %c0_i32_1 = arith.constant 0 : i32
    %c0_i32_2 = arith.constant 0 : i32
    return %c0_i32, %c0_i32_0, %c0_i32_1 : i32, i32, i32
  }
  func.func @transform_2(%arg0: i32) -> (i32, i32) {
    %c0_i32 = arith.constant 0 : i32
    %c0_i32_0 = arith.constant 0 : i32
    %c0_i32_1 = arith.constant 0 : i32
    return %c0_i32, %c0_i32_0 : i32, i32
  }
  func.func @transform_3(%arg0: i32) -> (i32, i32, i32) {
    %c0_i32 = arith.constant 0 : i32
    %c0_i32_0 = arith.constant 0 : i32
    %c0_i32_1 = arith.constant 0 : i32
    %c0_i32_2 = arith.constant 0 : i32
    return %c0_i32, %c0_i32_0, %c0_i32_1 : i32, i32, i32
  }
  func.func @transform_4(%arg0: i32) -> (i32, i32) {
    %c0_i32 = arith.constant 0 : i32
    %c0_i32_0 = arith.constant 0 : i32
    %c0_i32_1 = arith.constant 0 : i32
    return %c0_i32, %c0_i32_0 : i32, i32
  }
  func.func @transform_5(%arg0: i32) -> (i32, i32) {
    %c0_i32 = arith.constant 0 : i32
    %c0_i32_0 = arith.constant 0 : i32
    %c0_i32_1 = arith.constant 0 : i32
    return %c0_i32, %c0_i32_0 : i32, i32
  }
  func.func @transform_6(%arg0: i32) -> (i32, i32, i32) {
    %c0_i32 = arith.constant 0 : i32
    %c0_i32_0 = arith.constant 0 : i32
    %c0_i32_1 = arith.constant 0 : i32
    return %arg0, %c0_i32, %c0_i32_0 : i32, i32, i32
  }
}

</mosaic_0001>

<bundles_post_ra>
// kernel: tpu_custom_call.1
= control target key start
LH: loop header
LB: loop body
LE: loop exit
PB: predicated region body
PF: predicated region fallthrough
CT: control target
= control target key end

     0   :  { %11 = vsyncpa [#allocation4], 0  ;;  %s1162_s0 = inlined_call_operand.vmem [shape: f32[2,18,64], index: 0, kind: input, shape index: {}]   ;;  %s1163_s1 = inlined_call_operand.hbm [shape: f32[3,64,64], index: 1, kind: input, shape index: {}]   ;;  %s1164_s2 = inlined_call_operand.vmem [shape: f32[1,64], index: 2, kind: input, shape index: {}]   ;;  %s1165_s3 = inlined_call_operand.hbm [shape: f32[3,64,128], index: 3, kind: input, shape index: {}]   ;;  %s1166_s4 = inlined_call_operand.vmem [shape: f32[1,128], index: 4, kind: input, shape index: {}]   ;;  %s1167_s5 = inlined_call_operand.vmem [shape: f32[64,128], index: 5, kind: input, shape index: {}]   ;;  %s1168_s6 = inlined_call_operand.hbm [shape: f32[2,16,128], index: 6, kind: output, shape index: {}]  }
   0x1   :  { %12 = vsyncpa [#allocation7], 0 }
   0x2   :  { %13 = vsyncpa [#allocation5], 0 }
   0x3   :  { %15 = vsyncpa [#allocation5 + $0x1], 0  ;;  %s985_s21 = smov 0   ;;  %s987_s22 = smov 0  }
   0x4   :  { %s989_s23 = smov 0   ;;  %s991_s24 = smov 0  }
   0x5 LB: > { %s1006_s25 = sadd.s32 4294967295, %s941_s24   ;;  %s705_s26 = sadd.s32 4294967294, %s941_s24   ;;  %s941_s24 = sphi %s991_s24, %s1175_s24   ;;  %s937_s23 = sphi %s989_s23, %s1174_s23   ;;  %s933_s22 = sphi %s987_s22, %s1173_s22   ;;  %s929_s21 = sphi %s985_s21, %s1172_s21  }
   0x6   : > { %s1010_s27 = sadd.s32 1, %s941_s24   ;;  %s159_s28 = sadd.s32 1, %s937_s23 }
   0x7   : > { %s156_s29 = ssub.s32 %s941_s24, %s1010_s27  ;;  %p169_p0 = scmp.ne.s32.totalorder %s937_s23, %s933_s22 }
   0x8   : > { %p157_p1 = scmp.eq.s32.totalorder %s156_s29, 0  ;;  %p170_p2 = scmp.eq.s32.totalorder %s1006_s25, 1 }
   0x9   : > { %p175_p3 = scmp.ne.s32.totalorder %s933_s22, %s929_s21  ;;  %p176_p4 = scmp.eq.s32.totalorder %s705_s26, 1 }
   0xa   : > { %s1021_s30 = scalar_select %p157_p1, %s937_s23, %s159_s28  }
   0xb   : > { %p1023_p5 = por %p170_p2, %p169_p0  ;;  %p1027_p6 = por %p176_p4, %p175_p3 }
   0xc   : > { %p706_p7 = scmp.ge.s32.totalorder %s941_s24, 1  ;;  %p183_p8 = scmp.lt.s32.totalorder %s941_s24, 3 }
   0xd   : > { %p765_p9 = scmp.eq.s32.totalorder %s1006_s25, 0  ;;  %s194_s12 = sshll.u32 %s1163_s1, 4  ;;  %s195_s12 = int_to_ptr.hbm [resolvable:$true] %s194_s12 }
   0xe   : > { %p1034_p10 = pnand %p706_p7, %p183_p8  ;;  %s943_s13 = smov [#allocation3]  }
   0xf   : > { %s196_s14 = sshll.u32 %s943_s13, 4  ;;  %s211_s17 = sshll.u32 %s1165_s3, 4  ;;  %s197_s14 = int_to_ptr.vmem [resolvable:$true] %s196_s14  ;;  %s212_s17 = int_to_ptr.hbm [resolvable:$true] %s211_s17 }
  0x10   : > { %p754_p11 = pneg %p1034_p10  ;;  %s944_s18 = smov 128  }
  0x11   : > { %s945_s19 = smov 8   ;;  %s946_s20 = smov [#allocation6]  }
  0x12   : > { %p755_p12 = pnand %p765_p9, %p754_p11  ;;  %s213_s26 = sshll.u32 %s946_s20, 4  ;;  %s214_s26 = int_to_ptr.vmem [resolvable:$true] %s213_s26 }
  0x13   : > { %243 = sbr.rel (%p1034_p10) target bundleno = 351 (0x15f), region = 44 }
  0x14   : > { %757 = dma.hbm_to_vmem [thread:$0]  (!%p755_p12), %s195_s12, 3072, %s197_s14, [#allocation4], %s944_s18, %s944_s18, %s945_s19  }
  0x15   : > { %760 = dma.hbm_to_vmem [thread:$0]  (!%p755_p12), %s212_s17, 3072, %s214_s26, [#allocation7], %s944_s18, %s944_s18, %s945_s19  }
  0x18   : > { %916 = dma.done.wait (%p765_p9), [#allocation4], 3072  }
  0x19   : > { %918 = vsyncadd (%p765_p9), [#allocation4], 4294964224 }
  0x1a   : > { %920 = dma.done.wait (%p765_p9), [#allocation7], 3072  }
  0x1b   : > { %922 = vsyncadd (%p765_p9), [#allocation7], 4294964224  ;;  %p279_p13 = scmp.lt.s32.totalorder %s1006_s25, 1  ;;  %v382_v0 = vld [vmem:[#allocation3 + $0xb8] sm:$0xff]  ;;  %v381_v1 = vld [vmem:[#allocation3 + $0xb0] sm:$0xff]  ;;  %vm383_vm0 = vcmask 1045504  }
  0x1c   : > { %v309_v2 = vld [vmem:[#allocation3 + $0x78] sm:$0xff]  ;;  %401 = vmatpush.msra.mxu2 %v382_v0  ;;  %v308_v4 = vld [vmem:[#allocation3 + $0x70] sm:$0xff]  ;;  %v380_v5 = vld [vmem:[#allocation3 + $0xa8] sm:$0xff]  ;;  %vm313_vm1 = vcmask 1046528   ;;  %vm319_vm2 = vcmask 523264   ;;  %vm428_vm3 = vcmask 516096  }
  0x1d   : > { %s280_s28 = scalar_select %p279_p13, %s1006_s25, 1  ;;  %332 = vmatpush.msra.mxu0 %v309_v2  ;;  %v300_v3 = vld [vmem:[#allocation3 + $0x38] sm:$0xff]  ;;  %v299_v6 = vld [vmem:[#allocation3 + $0x30] sm:$0xff]  ;;  %v307_v7 = vld [vmem:[#allocation3 + $0x68] sm:$0xff]  ;;  %v947_v55 = vmov 0.0  }
  0x1e   : > { %359 = vmatpush.msra.mxu1 %v300_v3  ;;  %402 = vmatpush.msra.mxu2 %v381_v1  ;;  %v298_v8 = vld [vmem:[#allocation3 + $0x28] sm:$0xff]  ;;  %v379_v9 = vld [vmem:[#allocation3 + $0xa0] sm:$0xff]  ;;  %v378_v12 = vld [vmem:[#allocation3 + $0x98] sm:$0xff]  ;;  %429 = vst.msk [vmem:[#allocation2] sm:$0x1] %vm428_vm3, %v947_v55  ;;  %s276_s15 = sand.u32 1, %s933_s22  }
  0x1f   : > { %s743_s29 = smul.u32 24, %s280_s28  ;;  %333 = vmatpush.msra.mxu0 %v308_v4  ;;  %v306_v10 = vld [vmem:[#allocation3 + $0x60] sm:$0xff]  ;;  %v305_v13 = vld [vmem:[#allocation3 + $0x58] sm:$0xff]  ;;  %v377_v15 = vld [vmem:[#allocation3 + $0x90] sm:$0xff]  ;;  %430 = vst.msk [vmem:[#allocation2 + $0x11] sm:$0x1] %vm428_vm3, %v947_v55 }
  0x20   : > { %360 = vmatpush.msra.mxu1 %v299_v6  ;;  %403 = vmatpush.msra.mxu2 %v380_v5  ;;  %v297_v11 = vld [vmem:[#allocation3 + $0x20] sm:$0xff]  ;;  %v296_v16 = vld [vmem:[#allocation3 + $0x18] sm:$0xff]  ;;  %v304_v19 = vld [vmem:[#allocation3 + $0x50] sm:$0xff]  ;;  %s713_s18 = sshll.u32 %s276_s15, 4  ;;  %s734_s20 = sshll.u32 %s1006_s25, 4 }
  0x21   : > { %s283_s11 = scalar_lea.vmem %s1162_s0, %s743_s29  ;;  %334 = vmatpush.msra.mxu0 %v307_v7  ;;  %v295_v20 = vld [vmem:[#allocation3 + $0x10] sm:$0xff]  ;;  %v376_v25 = vld [vmem:[#allocation3 + $0x88] sm:$0xff]  ;;  %v375_v31 = vld [vmem:[#allocation3 + $0x80] sm:$0xff]  ;;  %s278_s19 = scalar_lea.vmem [#allocation8], %s713_s18 }
  0x22   : > { %361 = vmatpush.msra.mxu1 %v298_v8  ;;  %v1063_v14 = vld [vmem:[%s283_s11] sm:$0xff]  ;;  %404 = vmatpush.msra.mxu2 %v379_v9  ;;  %v1065_v17 = vld [vmem:[%s283_s11 + $0x8] sm:$0xff]  ;;  %v1069_v22 = vld [vmem:[%s283_s11 + $0x10] sm:$0x3]  ;;  %s617_s29 = scalar_lea.hbm %s1168_s6, %s734_s20  ;;  %s618_s9 = sshll.u32 %s278_s19, 4  ;;  %s619_s9 = int_to_ptr.vmem [resolvable:$true] %s618_s9 }
  0x23   : > { %335 = vmatpush.msra.mxu0 %v306_v10  ;;  %v287_v18 = vmul.f32 0.2, %v1063_v14  ;;  %v288_v21 = vmul.f32 0.2, %v1065_v17  ;;  %v289_v24 = vmul.f32 0.2, %v1069_v22 }
  0x24   : > { %362 = vmatpush.msra.mxu1 %v297_v11  ;;  %405 = vmatpush.msra.mxu2 %v378_v12  ;;  %v303_v27 = vld [vmem:[#allocation3 + $0x48] sm:$0xff]  ;;  %v302_v33 = vld [vmem:[#allocation3 + $0x40] sm:$0xff]  ;;  %v453_v43 = vld [vmem:[#allocation6 + $0x78] sm:$0xff]  ;;  %v571_v7 = vrot.slane %v1063_v14, 1  ;;  %v572_v8 = vrot.slane %v1065_v17, 1  ;;  %s620_s10 = sshll.u32 %s617_s29, 4  ;;  %s621_s10 = int_to_ptr.hbm [resolvable:$true] %s620_s10 }
  0x25   : > { %336 = vmatpush.msra.mxu0 %v305_v13  ;;  %v290_v23 = vmax.f32 %v1063_v14, %v287_v18  ;;  %v291_v26 = vmax.f32 %v1065_v17, %v288_v21  ;;  %v294_v29 = vld [vmem:[#allocation3 + $0x8] sm:$0xff]  ;;  %v293_v35 = vld [vmem:[#allocation3] sm:$0xff]  ;;  %v292_v36 = vmax.f32 %v1069_v22, %v289_v24  ;;  %v442_v44 = vld [vmem:[#allocation6 + $0x38] sm:$0xff]  ;;  %468 = vmatpush.msra.mxu3 %v453_v43  ;;  %v574_v21 = vrot.slane %v1069_v22, 1  ;;  %s606_s11 = scalar_lea.sflag [#allocation5], %s276_s15  ;;  %s885_s12 = sshra.s32 %s621_s10, 4  ;;  %s886_s12 = int_to_ptr.hbm [resolvable:$true] %s885_s12 }
  0x26   : > { %363 = vmatpush.msra.mxu1 %v296_v16  ;;  %406 = vmatpush.msra.mxu2 %v377_v15  ;;  %v452_v45 = vld [vmem:[#allocation6 + $0x70] sm:$0xff]  ;;  %v451_v47 = vld [vmem:[#allocation6 + $0x68] sm:$0xff]  ;;  %v450_v49 = vld [vmem:[#allocation6 + $0x60] sm:$0xff]  ;;  %v573_v13 = vsel %vm313_vm1, %v571_v7, %v572_v8  ;;  %s887_s25 = scalar_lea.hbm %s886_s12, 16  ;;  %s891_s16 = scalar_lea.hbm %s1168_s6, 32 }
  0x27   : > { %337 = vmatpush.msra.mxu0 %v304_v19  ;;  %v384_v28 = vrot.slane %v290_v23, 2  ;;  %v314_v30 = vrot.slane %v290_v23, 1  ;;  %v385_v32 = vrot.slane %v291_v26, 2  ;;  %v315_v34 = vrot.slane %v291_v26, 1  ;;  %v441_v46 = vld [vmem:[#allocation6 + $0x30] sm:$0xff]  ;;  %469 = vmatpush.msra.mxu3 %v452_v45  ;;  %v440_v48 = vld [vmem:[#allocation6 + $0x28] sm:$0xff]  ;;  %p888_p0 = scmp.ne.s32.totalorder %s886_s12, %s887_s25  ;;  %p892_p3 = scmp.lt.s32.totalorder %s886_s12, %s1168_s6 }
  0x28   : > { %364 = vmatpush.msra.mxu1 %v295_v20  ;;  %407 = vmatpush.msra.mxu2 %v376_v25  ;;  %v387_v39 = vrot.slane %v292_v36, 2  ;;  %v317_v40 = vrot.slane %v292_v36, 1  ;;  %v439_v50 = vld [vmem:[#allocation6 + $0x20] sm:$0xff]  ;;  %v449_v52 = vld [vmem:[#allocation6 + $0x58] sm:$0xff]  ;;  %v448_v57 = vld [vmem:[#allocation6 + $0x50] sm:$0xff]  ;;  %p893_p4 = scmp.lt.s32.totalorder %s891_s16, %s887_s25 }
  0x29   : > { %338 = vmatpush.msra.mxu0 %v303_v27  ;;  %v386_v37 = vsel %vm383_vm0, %v384_v28, %v385_v32  ;;  %v316_v38 = vsel %vm313_vm1, %v314_v30, %v315_v34  ;;  %470 = vmatpush.msra.mxu3 %v451_v47  ;;  %v567_v51 = vld [vmem:[%s1167_s5 + $0x38] sm:$0xff]  ;;  %v438_v53 = vld [vmem:[#allocation6 + $0x18] sm:$0xff]  ;;  %v437_v58 = vld [vmem:[#allocation6 + $0x10] sm:$0xff]  ;;  %p889_p1 = pnand %p888_p0, %p1023_p5 }
  0x2a   : > { %365 = vmatpush.msra.mxu1 %v294_v29  ;;  %408 = vmatpush.msra.mxu2 %v375_v31  ;;  %v388_v41 = vsel %vm383_vm0, %v385_v32, %v387_v39  ;;  %v318_v42 = vsel %vm313_vm1, %v315_v34, %v317_v40  ;;  %v522_v54 = vld [vmem:[#allocation6 + $0xb8] sm:$0xff]  ;;  %v521_v59 = vld [vmem:[#allocation6 + $0xb0] sm:$0xff]  ;;  %v447_v61 = vld [vmem:[#allocation6 + $0x48] sm:$0xff]  ;;  %p894_p7 = por %p893_p4, %p892_p3 }
  0x2b   : > { %339 = vmatpush.msra.mxu0 %v302_v33  ;;  %719 = vmatmul.msk.f32.vlgmr.msra.gmra.mxu2 %vm319_vm2, %v386_v37  ;;  %v566_v56 = vld [vmem:[%s1167_s5 + $0x30] sm:$0xff]  ;;  %v565_v60 = vld [vmem:[%s1167_s5 + $0x28] sm:$0xff]  ;;  %v436_v62 = vld [vmem:[#allocation6 + $0x8] sm:$0xff]  ;;  %p890_p2 = pneg %p889_p1 }
  0x2c   : > { %366 = vmatpush.msra.mxu1 %v293_v35  ;;  %715 = vmatmul.msk.f32.vlgmr.msra.gmra.mxu0 %vm319_vm2, %v316_v38  ;;  %v520_v63 = vld [vmem:[#allocation6 + $0xa8] sm:$0xff]  ;;  %v446_v1 = vld [vmem:[#allocation6 + $0x40] sm:$0xff]  ;;  %v518_v5 = vld [vmem:[#allocation6 + $0x98] sm:$0xff] }
  0x2d   : > { %717 = vmatmul.msk.f32.vlgmr.msra.gmra.mxu1 %vm319_vm2, %v290_v23  ;;  %497 = vmatpush.msrb.mxu0 %v442_v44  ;;  %v564_v0 = vld [vmem:[%s1167_s5 + $0x20] sm:$0xff]  ;;  %v435_v2 = vld [vmem:[#allocation6] sm:$0xff]  ;;  %v562_v6 = vld [vmem:[%s1167_s5 + $0x10] sm:$0xff]  ;;  %p895_p8 = pnand %p894_p7, %p890_p2 }
  0x2e   : > { %471 = vmatpush.msra.mxu3 %v450_v49  ;;  %588 = vmatpush.msrb.mxu2 %v567_v51  ;;  %v519_v3 = vld [vmem:[#allocation6 + $0xa0] sm:$0xff]  ;;  %v517_v9 = vld [vmem:[#allocation6 + $0x90] sm:$0xff]  ;;  %v516_v11 = vld [vmem:[#allocation6 + $0x88] sm:$0xff] }
  0x2f   : > { %498 = vmatpush.msrb.mxu0 %v441_v46  ;;  %537 = vmatpush.msrb.mxu1 %v522_v54  ;;  %v563_v4 = vld [vmem:[%s1167_s5 + $0x18] sm:$0xff]  ;;  %v561_v10 = vld [vmem:[%s1167_s5 + $0x8] sm:$0xff]  ;;  %v560_v12 = vld [vmem:[%s1167_s5] sm:$0xff] }
  0x30   : > { %472 = vmatpush.msra.mxu3 %v449_v52  ;;  %589 = vmatpush.msrb.mxu2 %v566_v56  ;;  %v515_v14 = vld [vmem:[#allocation6 + $0x80] sm:$0xff]  ;;  %v809_v18 = vld [vmem:[%s1164_s2] ss:$0 sm:$0xff] }
  0x31   : > { %499 = vmatpush.msrb.mxu0 %v440_v48  ;;  %538 = vmatpush.msrb.mxu1 %v521_v59  ;;  %v810_v43 = vld [vmem:[%s1166_s4] ss:$0 sm:$0xff] }
  0x32   : > { %473 = vmatpush.msra.mxu3 %v448_v57  ;;  %590 = vmatpush.msrb.mxu2 %v565_v60 }
  0x33   : > { %720 = vmatmul.msk.f32.gmra.mxu2 %vm319_vm2, %v388_v41  ;;  %500 = vmatpush.msrb.mxu0 %v439_v50 }
  0x34   : > { %716 = vmatmul.msk.f32.gmra.mxu0 %vm319_vm2, %v318_v42  ;;  %474 = vmatpush.msra.mxu3 %v447_v61 }
  0x35   : > { %718 = vmatmul.msk.f32.gmra.mxu1 %vm319_vm2, %v291_v26  ;;  %501 = vmatpush.msrb.mxu0 %v438_v53  ;;  %v575_v26 = vsel %vm313_vm1, %v572_v8, %v574_v21 }
  0x36   : > { %539 = vmatpush.msrb.mxu1 %v520_v63  ;;  %591 = vmatpush.msrb.mxu2 %v564_v0 }
  0x37   : > { %502 = vmatpush.msrb.mxu0 %v437_v58  ;;  %475 = vmatpush.msra.mxu3 %v446_v1 }
  0x38   : > { %540 = vmatpush.msrb.mxu1 %v519_v3  ;;  %592 = vmatpush.msrb.mxu2 %v563_v4 }
  0x39   : > { %503 = vmatpush.msrb.mxu0 %v436_v62  ;;  %735 = vmatpush.msrb.mxu3 %v442_v44 }
  0x3a   : > { %541 = vmatpush.msrb.mxu1 %v518_v5  ;;  %593 = vmatpush.msrb.mxu2 %v562_v6 }
  0x3b   : > { %504 = vmatpush.msrb.mxu0 %v435_v2  ;;  %736 = vmatpush.msrb.mxu3 %v441_v46 }
  0x3c   : > { %542 = vmatpush.msrb.mxu1 %v517_v9  ;;  %594 = vmatpush.msrb.mxu2 %v561_v10 }
  0x3d   : > { %737 = vmatpush.msrb.mxu3 %v440_v48 }
  0x3e   : > { %543 = vmatpush.msrb.mxu1 %v516_v11  ;;  %595 = vmatpush.msrb.mxu2 %v560_v12 }
  0x3f   : > { %738 = vmatpush.msrb.mxu3 %v439_v50  ;;  %727 = vmatmul.msk.f32.vlgmr.msrb.gmra.mxu2 %vm319_vm2, %v573_v13 }
  0x40   : > { %544 = vmatpush.msrb.mxu1 %v515_v14 }
  0x41   : > { %739 = vmatpush.msrb.mxu3 %v438_v53 }
  0x43   : > { %740 = vmatpush.msrb.mxu3 %v437_v58 }
  0x45   : > { %741 = vmatpush.msrb.mxu3 %v436_v62 }
  0x47   : > { %742 = vmatpush.msrb.mxu3 %v435_v2  ;;  %728 = vmatmul.msk.f32.gmra.mxu2 %vm319_vm2, %v575_v26 }
  0xa9   : > { %v341_v15 = vpop.f32.mrf.mxu0 }
  0xaa   : > { %v368_v16 = vpop.f32.mrf.mxu1 }
  0xab   : > { %v369_v17 = vadd.f32 %v368_v16, %v341_v15 }
  0xae   : > { %v410_v19 = vpop.f32.mrf.mxu2 }
  0xaf   : > { %v416_v20 = vadd.f32 %v410_v19, %v369_v17 }
  0xb1   : > { %v422_v23 = vadd.f32 %v809_v18, %v416_v20  ;;  %v344_v24 = vpop.f32.mrf.mxu0 }
  0xb2   : > { %v371_v25 = vpop.f32.mrf.mxu1 }
  0xb3   : > { %v424_v27 = vmul.f32 0.2, %v422_v23  ;;  %v372_v28 = vadd.f32 %v371_v25, %v344_v24 }
  0xb5   : > { %v426_v29 = vmax.f32 %v422_v23, %v424_v27 }
  0xb6   : > { %v413_v30 = vpop.f32.mrf.mxu2 }
  0xb7   : > { %431 = vst.msk [vmem:[#allocation2 + $0x1] sm:$0xff] %vm319_vm2, %v426_v29  ;;  %v417_v31 = vadd.f32 %v413_v30, %v372_v28 }
  0xb9   : > { %v423_v32 = vadd.f32 %v809_v18, %v417_v31 }
  0xbb   : > { %v425_v33 = vmul.f32 0.2, %v423_v32 }
  0xbd   : > { %v427_v34 = vmax.f32 %v423_v32, %v425_v33 }
  0xbe   : > { %v443_v35 = vld [vmem:[#allocation2 + $0x1] sm:$0xff] }
  0xbf   : > { %v433_v22 = vld [vmem:[#allocation2] sm:$0xff]  ;;  %432 = vst.msk [vmem:[#allocation2 + $0x9] sm:$0xff] %vm319_vm2, %v427_v34  ;;  %721 = vmatmul.msk.f32.vlgmr.msra.gmra.mxu3 %vm319_vm2, %v443_v35 }
  0xc0   : > { %723 = vmatmul.msk.f32.vlgmr.msrb.gmra.mxu0 %vm319_vm2, %v433_v22 }
  0xc2   : > { %v597_v46 = vpop.f32.mrf.mxu2 }
  0xc6   : > { %v444_v36 = vld [vmem:[#allocation2 + $0x9] sm:$0xff] }
  0xc7   : > { %v512_v37 = vld [vmem:[#allocation2 + $0x2] sm:$0xff]  ;;  %722 = vmatmul.msk.f32.gmra.mxu3 %vm319_vm2, %v444_v36  ;;  %v513_v39 = vld [vmem:[#allocation2 + $0xa] sm:$0xff] }
  0xc8   : > { %725 = vmatmul.msk.f32.vlgmr.msrb.gmra.mxu1 %vm319_vm2, %v512_v37  ;;  %v434_v38 = vld [vmem:[#allocation2 + $0x8] sm:$0xff] }
  0xca   : > { %v600_v54 = vpop.f32.mrf.mxu2 }
  0xcf   : > { %724 = vmatmul.msk.f32.vlgmr.msrb.gmra.mxu3 %vm319_vm2, %v434_v38 }
  0xd0   : > { %726 = vmatmul.msk.f32.gmra.mxu1 %vm319_vm2, %v513_v39 }
 0x13d   : > { %v506_v40 = vpop.f32.mrf.mxu0 }
 0x142   : > { %v477_v41 = vpop.f32.mrf.mxu3 }
 0x143   : > { %v507_v42 = vadd.f32 %v506_v40, %v477_v41 }
 0x145   : > { %v546_v44 = vpop.f32.mrf.mxu1 }
 0x146   : > { %v552_v45 = vadd.f32 %v546_v44, %v507_v42 }
 0x148   : > { %v558_v47 = vadd.f32 %v810_v43, %v552_v45 }
 0x14a   : > { %v598_v48 = vadd.f32 %v597_v46, %v558_v47  ;;  %v480_v49 = vpop.f32.mrf.mxu3 }
 0x14c   : > { %603 = vst [vmem:[%s278_s19] sm:$0xff] %v598_v48 }
 0x14d   : > { %v549_v52 = vpop.f32.mrf.mxu1 }
 0x152   : > { %v509_v50 = vpop.f32.mrf.mxu3 }
 0x153   : > { %v510_v51 = vadd.f32 %v509_v50, %v480_v49 }
 0x155   : > { %v553_v53 = vadd.f32 %v549_v52, %v510_v51 }
 0x157   : > { %v559_v55 = vadd.f32 %v810_v43, %v553_v53 }
 0x159   : > { %v601_v56 = vadd.f32 %v600_v54, %v559_v55 }
 0x15b   : > { %604 = vst [vmem:[%s278_s19 + $0x8] sm:$0xff] %v601_v56 }
 0x15c   : > { %898 = shalt.err (!%p895_p8)
}
 0x15d   : > { %s948_s15 = smov 128   ;;  %s949_s19 = smov 8  }
 0x15e   : > { %752 = dma.vmem_to_hbm [thread:$0]  (%p1023_p5), %s619_s9, 256, %s621_s10, %s606_s11, %s948_s15, %s948_s15, %s949_s19  }
 0x15f PF: > { %p769_p9 = scmp.ge.s32.totalorder %s941_s24, 2  ;;  %s635_s20 = sand.u32 1, %s929_s21  }
 0x160   : > { %s636_s26 = scalar_lea.sflag [#allocation5], %s635_s20 }
 0x161   : > { %p762_p10 = pnand %p769_p9, %p1027_p6 }
 0x163   : > { %p763_p11 = pneg %p762_p10 }
 0x165   : > { %924 = dma.done.wait (%p763_p11), %s636_s26, 256  }
 0x166   : > { %926 = vsyncadd (%p763_p11), %s636_s26, 4294967040  ;;  %p18_p12 = scmp.ge.s32.totalorder %s1010_s27, 4   ;;  %s1172_s21 = smov %s933_s22 }
 0x167   : > { %s1173_s22 = smov %s937_s23  ;;  %s1174_s23 = smov %s1021_s30 }
 0x168   : > { %s1175_s24 = smov %s1010_s27  ;;  %20 = sbr.rel (!%p18_p12) target bundleno = 5 (0x5), region = 92 }
 0x16d   :  { %642 = vsyncpa [#allocation4], 1 }
 0x16e   :  { %644 = vsyncpa [#allocation4 + $0x1], 1 }
 0x16f   :  { %645 = vsyncpa [#allocation7], 1 }
 0x170   :  { %646 = vsyncpa [#allocation5], 1 }
 0x171   :  { %648 = vsyncpa [#allocation5 + $0x1], 1 }

</bundles_post_ra>
